<compile_context>
chip_gen: v7x
topology: tpu7x:2x2x1
jax: 0.10.0
libtpu: 0.0.40
codegen_flags: <defaults>
</compile_context>

<pallas_src>
import jax
import jax.numpy as jnp
from jax import lax
from jax.experimental import pallas as pl
from jax.experimental.pallas import tpu as pltpu

# ---- module hyperparameters (from the PyTorch script) -----------------------
embedding_dim = 10
hidden_dim = 20
corpus = ['hello how are you', 'I am fine thank you', 'how is your day',
          'it is great and sunny']
words = set(' '.join(corpus).split())
vocab_size = len(words)  # 15

GATE_LANES = 128   # one full lane-tile per gate
B_PAD = 8          # sublane multiple; up to 8 sequences per call are free


# ---- Pallas kernel: fused embedding gather + LSTM recurrence + final Linear --
def lstm_fc_kernel(ids_ref, table_ref, whh_ref, fcw_ref, fcb_ref, out_ref):
    # ids_ref  : (T*Bp, 1) int32   token ids, time-major (row t*Bp + b)
    # table_ref: (V, 4*128)        token -> gate pre-activations (bias folded),
    #                              gate tiles in order [i, f, o, g], lanes >= H are 0
    # whh_ref  : (128, 4*128)      recurrent weights, zero-padded rows/cols
    # fcw_ref  : (128, 128)        final Linear weight (transposed, zero-padded)
    # fcb_ref  : (1, 128)          final Linear bias (zero-padded)
    # out_ref  : (Bp, 128)         padded logits for the last timestep
    Bp = out_ref.shape[0]
    TB = ids_ref.shape[0]
    T = TB // Bp
    G = GATE_LANES
    V = table_ref.shape[0]

    # (1) fused embedding gather + input projection + bias for ALL timesteps via a
    #     one-hot matmul against the precomputed (V, 4*128) table.  Prologue work,
    #     off the serial recurrence chain.
    ids = ids_ref[...]                                              # (T*Bp, 1)
    onehot = (ids == lax.broadcasted_iota(jnp.int32, (TB, V), 1)).astype(jnp.float32)
    x_proj = jnp.dot(onehot, table_ref[...],
                     preferred_element_type=jnp.float32)            # (T*Bp, 4*128)

    whh = whh_ref[...]                                              # (128, 4*128)

    # (2) single-tanh activation constants (built once, full shape -> no per-step
    #     broadcasts):  sigmoid(x) = 0.5*tanh(0.5*x) + 0.5 on the i/f/o tiles,
    #     plain tanh on the g tile.
    lane = lax.broadcasted_iota(jnp.int32, (Bp, 4 * G), 1)
    is_sig = lane < 3 * G
    scale = jnp.where(is_sig, 0.5, 1.0)                             # (Bp, 4*128)
    offset = jnp.where(is_sig, 0.5, 0.0)                            # (Bp, 4*128)

    # (3) serial recurrence -- only h @ W_hh, one tanh pass, and a few VPU ops
    #     remain on the critical path.  Fully unrolled (T static).
    h = jnp.zeros((Bp, G), jnp.float32)
    c = jnp.zeros((Bp, G), jnp.float32)
    for t in range(T):
        gates = x_proj[t * Bp:(t + 1) * Bp] + jnp.dot(
            h, whh, preferred_element_type=jnp.float32)             # (Bp, 4*128)
        act = jnp.tanh(gates * scale) * scale + offset              # one EUP pass
        i = act[:, 0 * G:1 * G]                                     # lane-aligned
        f = act[:, 1 * G:2 * G]
        o = act[:, 2 * G:3 * G]
        g = act[:, 3 * G:4 * G]
        c = f * c + i * g
        h = o * jnp.tanh(c)

    # (4) final projection of the last hidden state -- lane/sublane-dense store.
    out_ref[...] = (jnp.dot(h, fcw_ref[...],
                            preferred_element_type=jnp.float32) + fcb_ref[...])


# ---- one-time parameter preparation (hoisted out of the per-call path) -------
def _split_gates(a):
    """PyTorch packs gates as [i, f, g, o] along dim 0; return them as [i, f, o, g]."""
    i, f, g, o = jnp.split(a, 4, axis=0)
    return i, f, o, g


def prepare_params(params):
    E, H, V = embedding_dim, hidden_dim, vocab_size
    G = GATE_LANES
    hi = jax.lax.Precision.HIGHEST

    def pad_gate_cols(mat_t):  # (rows, H) -> (rows, 128), zero-padded
        return jnp.pad(mat_t, ((0, 0), (0, G - H)))

    # W_ih^T / W_hh^T / bias laid out as 4 gate tiles of 128 lanes each ([i,f,o,g]).
    wih_pad = jnp.concatenate(
        [pad_gate_cols(gw.T) for gw in _split_gates(params["w_ih"])], axis=1)      # (E, 512)
    whh_t = jnp.concatenate(
        [pad_gate_cols(gw.T) for gw in _split_gates(params["w_hh"])], axis=1)      # (H, 512)
    whh_pad = jnp.pad(whh_t, ((0, G - H), (0, 0)))                                 # (128, 512)

    b = params["b_ih"] + params["b_hh"]
    b_pad = jnp.concatenate(
        [jnp.pad(gb, (0, G - H)) for gb in _split_gates(b)]).reshape(1, 4 * G)     # (1, 512)

    # Token -> gate pre-activation table (parameter-only work, done once, exact-ish).
    table = (jnp.dot(params["embedding"].astype(jnp.float32), wih_pad,
                     precision=hi) + b_pad)                                        # (V, 512)

    # Final Linear, padded lane-dense (rows follow h's 128-lane layout).
    fcw_pad = jnp.zeros((G, G), jnp.float32).at[:H, :V].set(
        params["fc_w"].astype(jnp.float32).T)                                      # (128, 128)
    fcb_pad = jnp.pad(params["fc_b"].astype(jnp.float32), (0, G - V)).reshape(1, G)

    return {"table": table, "whh": whh_pad, "fcw": fcw_pad, "fcb": fcb_pad}


@jax.jit
def lstm_forward(x_ids, prepped):
    """x_ids: (B, T) int token indices. Returns (B, vocab_size) logits."""
    B, T = x_ids.shape
    V = vocab_size
    Bp = max(B_PAD, ((B + 7) // 8) * 8)        # pad batch to a sublane multiple

    # Only per-call data work: pad batch, time-major flatten the ids.
    ids = jnp.zeros((Bp, T), jnp.int32).at[:B, :].set(x_ids.astype(jnp.int32))
    ids_tm = ids.T.reshape(T * Bp, 1)          # row t*Bp + b  <-  (timestep t, batch b)

    vmem = pl.BlockSpec(memory_space=pltpu.MemorySpace.VMEM)
    out_pad = pl.pallas_call(
        lstm_fc_kernel,
        out_shape=jax.ShapeDtypeStruct((Bp, GATE_LANES), jnp.float32),
        in_specs=[vmem] * 5,
        out_specs=vmem,
    )(ids_tm, prepped["table"], prepped["whh"], prepped["fcw"], prepped["fcb"])
    return out_pad[:B, :V]


# ---- pure-JAX reference mirroring torch semantics (sanity check) -------------
def lstm_forward_ref(x_ids, params):
    emb = params["embedding"]
    x_emb = jnp.take(emb, x_ids, axis=0)           # (B, T, E)
    H = hidden_dim
    B, T, _ = x_emb.shape
    wih, whh = params["w_ih"], params["w_hh"]
    b = params["b_ih"] + params["b_hh"]

    def step(carry, x_t):
        h, c = carry
        gates = x_t @ wih.T + h @ whh.T + b        # PyTorch order: i, f, g, o
        i = jax.nn.sigmoid(gates[:, 0 * H:1 * H])
        f = jax.nn.sigmoid(gates[:, 1 * H:2 * H])
        g = jnp.tanh(gates[:, 2 * H:3 * H])
        o = jax.nn.sigmoid(gates[:, 3 * H:4 * H])
        c = f * c + i * g
        h = o * jnp.tanh(c)
        return (h, c), None

    h0 = jnp.zeros((B, H), jnp.float32)
    c0 = jnp.zeros((B, H), jnp.float32)
    (h_last, _), _ = lax.scan(step, (h0, c0), jnp.transpose(x_emb, (1, 0, 2)))
    return h_last @ params["fc_w"].T + params["fc_b"]


def init_params(key):
    """Deterministic synthetic parameters (shapes follow nn.Embedding/nn.LSTM/nn.Linear)."""
    E, H, V = embedding_dim, hidden_dim, vocab_size
    k = jax.random.split(key, 7)
    s_lstm = 1.0 / jnp.sqrt(H)
    s_fc = 1.0 / jnp.sqrt(H)
    return {
        "embedding": jax.random.normal(k[0], (V, E), jnp.float32),
        "w_ih": jax.random.uniform(k[1], (4 * H, E), jnp.float32, -s_lstm, s_lstm),
        "w_hh": jax.random.uniform(k[2], (4 * H, H), jnp.float32, -s_lstm, s_lstm),
        "b_ih": jax.random.uniform(k[3], (4 * H,), jnp.float32, -s_lstm, s_lstm),
        "b_hh": jax.random.uniform(k[4], (4 * H,), jnp.float32, -s_lstm, s_lstm),
        "fc_w": jax.random.uniform(k[5], (V, H), jnp.float32, -s_fc, s_fc),
        "fc_b": jax.random.uniform(k[6], (V,), jnp.float32, -s_fc, s_fc),
    }


if __name__ == "__main__":
    key = jax.random.PRNGKey(0)
    pkey, xkey = jax.random.split(key)
    params = init_params(pkey)
    prepped = prepare_params(params)          # one-time, out of the per-call path

    B, T = 2, 6
    x_ids = jax.random.randint(xkey, (B, T), 0, vocab_size, dtype=jnp.int32)

    out = jax.block_until_ready(lstm_forward(x_ids, prepped))

    ref = jax.block_until_ready(lstm_forward_ref(x_ids, params))
    assert out.shape == (B, vocab_size)
    assert jnp.allclose(out, ref, atol=1e-3, rtol=1e-3), "mismatch vs reference"

    print("KERNEL_OK")
</pallas_src>

<mosaic_0001>
module attributes {stable_mosaic.version = 11 : i64} {
  func.func @lstm_fc_kernel(%arg0: memref<48x1xi32, #tpu.memory_space<vmem>>, %arg1: memref<15x512xf32, #tpu.memory_space<vmem>>, %arg2: memref<128x512xf32, #tpu.memory_space<vmem>>, %arg3: memref<128x128xf32, #tpu.memory_space<vmem>>, %arg4: memref<1x128xf32, #tpu.memory_space<vmem>>, %arg5: memref<8x128xf32, #tpu.memory_space<vmem>>) attributes {dimension_semantics = [], scalar_prefetch = 0 : i64, scratch_operands = 0 : i64, tpu.core_type = #tpu.core_type<tc>} {
    %c0 = arith.constant 0 : index
    %c0_0 = arith.constant 0 : index
    %0 = vector.load %arg0[%c0, %c0_0] : memref<48x1xi32, #tpu.memory_space<vmem>>, vector<48x1xi32>
    %1 = tpu.iota {dimensions = array<i32: 1>} : vector<48x15xi32>
    %2 = vector.broadcast %0 : vector<48x1xi32> to vector<48x15xi32>
    %3 = arith.cmpi eq, %2, %1 : vector<48x15xi32>
    %4 = arith.extui %3 : vector<48x15xi1> to vector<48x15xi32>
    %5 = arith.sitofp %4 : vector<48x15xi32> to vector<48x15xf32>
    %c0_1 = arith.constant 0 : index
    %c0_2 = arith.constant 0 : index
    %6 = vector.load %arg1[%c0_1, %c0_2] : memref<15x512xf32, #tpu.memory_space<vmem>>, vector<15x512xf32>
    %cst = arith.constant dense<0.000000e+00> : vector<48x512xf32>
    %7 = tpu.matmul %5, %6, %cst {dimension_numbers = #tpu.dot_dimension_numbers<[1], [0], [0], [1], [0, 0, 1, 1], [], []>} : vector<48x15xf32>, vector<15x512xf32>, vector<48x512xf32> -> vector<48x512xf32>
    %c0_3 = arith.constant 0 : index
    %c0_4 = arith.constant 0 : index
    %8 = vector.load %arg2[%c0_3, %c0_4] : memref<128x512xf32, #tpu.memory_space<vmem>>, vector<128x512xf32>
    %9 = tpu.iota {dimensions = array<i32: 1>} : vector<8x512xi32>
    %c384_i32 = arith.constant 384 : i32
    %10 = vector.broadcast %c384_i32 : i32 to vector<8x512xi32>
    %11 = arith.cmpi slt, %9, %10 : vector<8x512xi32>
    %cst_5 = arith.constant 5.000000e-01 : f32
    %cst_6 = arith.constant 1.000000e+00 : f32
    %12 = vector.broadcast %cst_5 : f32 to vector<8x512xf32>
    %13 = vector.broadcast %cst_6 : f32 to vector<8x512xf32>
    %14 = arith.select %11, %12, %13 : vector<8x512xi1>, vector<8x512xf32>
    %cst_7 = arith.constant 5.000000e-01 : f32
    %cst_8 = arith.constant 0.000000e+00 : f32
    %15 = vector.broadcast %cst_7 : f32 to vector<8x512xf32>
    %16 = vector.broadcast %cst_8 : f32 to vector<8x512xf32>
    %17 = arith.select %11, %15, %16 : vector<8x512xi1>, vector<8x512xf32>
    %cst_9 = arith.constant 0.000000e+00 : f32
    %18 = vector.broadcast %cst_9 : f32 to vector<8x128xf32>
    %cst_10 = arith.constant 0.000000e+00 : f32
    %19 = vector.broadcast %cst_10 : f32 to vector<8x128xf32>
    %20 = vector.extract_strided_slice %7 {offsets = [0, 0], sizes = [8, 512], strides = [1, 1]} : vector<48x512xf32> to vector<8x512xf32>
    %cst_11 = arith.constant dense<0.000000e+00> : vector<8x512xf32>
    %21 = tpu.matmul %18, %8, %cst_11 {dimension_numbers = #tpu.dot_dimension_numbers<[1], [0], [0], [1], [0, 0, 1, 1], [], []>} : vector<8x128xf32>, vector<128x512xf32>, vector<8x512xf32> -> vector<8x512xf32>
    %22 = arith.addf %20, %21 : vector<8x512xf32>
    %23 = arith.mulf %22, %14 : vector<8x512xf32>
    %24 = math.tanh %23 : vector<8x512xf32>
    %25 = arith.mulf %24, %14 : vector<8x512xf32>
    %26 = arith.addf %25, %17 : vector<8x512xf32>
    %27 = vector.extract_strided_slice %26 {offsets = [0, 0], sizes = [8, 128], strides = [1, 1]} : vector<8x512xf32> to vector<8x128xf32>
    %28 = vector.extract_strided_slice %26 {offsets = [0, 128], sizes = [8, 128], strides = [1, 1]} : vector<8x512xf32> to vector<8x128xf32>
    %29 = vector.extract_strided_slice %26 {offsets = [0, 256], sizes = [8, 128], strides = [1, 1]} : vector<8x512xf32> to vector<8x128xf32>
    %30 = vector.extract_strided_slice %26 {offsets = [0, 384], sizes = [8, 128], strides = [1, 1]} : vector<8x512xf32> to vector<8x128xf32>
    %31 = arith.mulf %28, %19 : vector<8x128xf32>
    %32 = arith.mulf %27, %30 : vector<8x128xf32>
    %33 = arith.addf %31, %32 : vector<8x128xf32>
    %34 = math.tanh %33 : vector<8x128xf32>
    %35 = arith.mulf %29, %34 : vector<8x128xf32>
    %36 = vector.extract_strided_slice %7 {offsets = [8, 0], sizes = [8, 512], strides = [1, 1]} : vector<48x512xf32> to vector<8x512xf32>
    %cst_12 = arith.constant dense<0.000000e+00> : vector<8x512xf32>
    %37 = tpu.matmul %35, %8, %cst_12 {dimension_numbers = #tpu.dot_dimension_numbers<[1], [0], [0], [1], [0, 0, 1, 1], [], []>} : vector<8x128xf32>, vector<128x512xf32>, vector<8x512xf32> -> vector<8x512xf32>
    %38 = arith.addf %36, %37 : vector<8x512xf32>
    %39 = arith.mulf %38, %14 : vector<8x512xf32>
    %40 = math.tanh %39 : vector<8x512xf32>
    %41 = arith.mulf %40, %14 : vector<8x512xf32>
    %42 = arith.addf %41, %17 : vector<8x512xf32>
    %43 = vector.extract_strided_slice %42 {offsets = [0, 0], sizes = [8, 128], strides = [1, 1]} : vector<8x512xf32> to vector<8x128xf32>
    %44 = vector.extract_strided_slice %42 {offsets = [0, 128], sizes = [8, 128], strides = [1, 1]} : vector<8x512xf32> to vector<8x128xf32>
    %45 = vector.extract_strided_slice %42 {offsets = [0, 256], sizes = [8, 128], strides = [1, 1]} : vector<8x512xf32> to vector<8x128xf32>
    %46 = vector.extract_strided_slice %42 {offsets = [0, 384], sizes = [8, 128], strides = [1, 1]} : vector<8x512xf32> to vector<8x128xf32>
    %47 = arith.mulf %44, %33 : vector<8x128xf32>
    %48 = arith.mulf %43, %46 : vector<8x128xf32>
    %49 = arith.addf %47, %48 : vector<8x128xf32>
    %50 = math.tanh %49 : vector<8x128xf32>
    %51 = arith.mulf %45, %50 : vector<8x128xf32>
    %52 = vector.extract_strided_slice %7 {offsets = [16, 0], sizes = [8, 512], strides = [1, 1]} : vector<48x512xf32> to vector<8x512xf32>
    %cst_13 = arith.constant dense<0.000000e+00> : vector<8x512xf32>
    %53 = tpu.matmul %51, %8, %cst_13 {dimension_numbers = #tpu.dot_dimension_numbers<[1], [0], [0], [1], [0, 0, 1, 1], [], []>} : vector<8x128xf32>, vector<128x512xf32>, vector<8x512xf32> -> vector<8x512xf32>
    %54 = arith.addf %52, %53 : vector<8x512xf32>
    %55 = arith.mulf %54, %14 : vector<8x512xf32>
    %56 = math.tanh %55 : vector<8x512xf32>
    %57 = arith.mulf %56, %14 : vector<8x512xf32>
    %58 = arith.addf %57, %17 : vector<8x512xf32>
    %59 = vector.extract_strided_slice %58 {offsets = [0, 0], sizes = [8, 128], strides = [1, 1]} : vector<8x512xf32> to vector<8x128xf32>
    %60 = vector.extract_strided_slice %58 {offsets = [0, 128], sizes = [8, 128], strides = [1, 1]} : vector<8x512xf32> to vector<8x128xf32>
    %61 = vector.extract_strided_slice %58 {offsets = [0, 256], sizes = [8, 128], strides = [1, 1]} : vector<8x512xf32> to vector<8x128xf32>
    %62 = vector.extract_strided_slice %58 {offsets = [0, 384], sizes = [8, 128], strides = [1, 1]} : vector<8x512xf32> to vector<8x128xf32>
    %63 = arith.mulf %60, %49 : vector<8x128xf32>
    %64 = arith.mulf %59, %62 : vector<8x128xf32>
    %65 = arith.addf %63, %64 : vector<8x128xf32>
    %66 = math.tanh %65 : vector<8x128xf32>
    %67 = arith.mulf %61, %66 : vector<8x128xf32>
    %68 = vector.extract_strided_slice %7 {offsets = [24, 0], sizes = [8, 512], strides = [1, 1]} : vector<48x512xf32> to vector<8x512xf32>
    %cst_14 = arith.constant dense<0.000000e+00> : vector<8x512xf32>
    %69 = tpu.matmul %67, %8, %cst_14 {dimension_numbers = #tpu.dot_dimension_numbers<[1], [0], [0], [1], [0, 0, 1, 1], [], []>} : vector<8x128xf32>, vector<128x512xf32>, vector<8x512xf32> -> vector<8x512xf32>
    %70 = arith.addf %68, %69 : vector<8x512xf32>
    %71 = arith.mulf %70, %14 : vector<8x512xf32>
    %72 = math.tanh %71 : vector<8x512xf32>
    %73 = arith.mulf %72, %14 : vector<8x512xf32>
    %74 = arith.addf %73, %17 : vector<8x512xf32>
    %75 = vector.extract_strided_slice %74 {offsets = [0, 0], sizes = [8, 128], strides = [1, 1]} : vector<8x512xf32> to vector<8x128xf32>
    %76 = vector.extract_strided_slice %74 {offsets = [0, 128], sizes = [8, 128], strides = [1, 1]} : vector<8x512xf32> to vector<8x128xf32>
    %77 = vector.extract_strided_slice %74 {offsets = [0, 256], sizes = [8, 128], strides = [1, 1]} : vector<8x512xf32> to vector<8x128xf32>
    %78 = vector.extract_strided_slice %74 {offsets = [0, 384], sizes = [8, 128], strides = [1, 1]} : vector<8x512xf32> to vector<8x128xf32>
    %79 = arith.mulf %76, %65 : vector<8x128xf32>
    %80 = arith.mulf %75, %78 : vector<8x128xf32>
    %81 = arith.addf %79, %80 : vector<8x128xf32>
    %82 = math.tanh %81 : vector<8x128xf32>
    %83 = arith.mulf %77, %82 : vector<8x128xf32>
    %84 = vector.extract_strided_slice %7 {offsets = [32, 0], sizes = [8, 512], strides = [1, 1]} : vector<48x512xf32> to vector<8x512xf32>
    %cst_15 = arith.constant dense<0.000000e+00> : vector<8x512xf32>
    %85 = tpu.matmul %83, %8, %cst_15 {dimension_numbers = #tpu.dot_dimension_numbers<[1], [0], [0], [1], [0, 0, 1, 1], [], []>} : vector<8x128xf32>, vector<128x512xf32>, vector<8x512xf32> -> vector<8x512xf32>
    %86 = arith.addf %84, %85 : vector<8x512xf32>
    %87 = arith.mulf %86, %14 : vector<8x512xf32>
    %88 = math.tanh %87 : vector<8x512xf32>
    %89 = arith.mulf %88, %14 : vector<8x512xf32>
    %90 = arith.addf %89, %17 : vector<8x512xf32>
    %91 = vector.extract_strided_slice %90 {offsets = [0, 0], sizes = [8, 128], strides = [1, 1]} : vector<8x512xf32> to vector<8x128xf32>
    %92 = vector.extract_strided_slice %90 {offsets = [0, 128], sizes = [8, 128], strides = [1, 1]} : vector<8x512xf32> to vector<8x128xf32>
    %93 = vector.extract_strided_slice %90 {offsets = [0, 256], sizes = [8, 128], strides = [1, 1]} : vector<8x512xf32> to vector<8x128xf32>
    %94 = vector.extract_strided_slice %90 {offsets = [0, 384], sizes = [8, 128], strides = [1, 1]} : vector<8x512xf32> to vector<8x128xf32>
    %95 = arith.mulf %92, %81 : vector<8x128xf32>
    %96 = arith.mulf %91, %94 : vector<8x128xf32>
    %97 = arith.addf %95, %96 : vector<8x128xf32>
    %98 = math.tanh %97 : vector<8x128xf32>
    %99 = arith.mulf %93, %98 : vector<8x128xf32>
    %100 = vector.extract_strided_slice %7 {offsets = [40, 0], sizes = [8, 512], strides = [1, 1]} : vector<48x512xf32> to vector<8x512xf32>
    %cst_16 = arith.constant dense<0.000000e+00> : vector<8x512xf32>
    %101 = tpu.matmul %99, %8, %cst_16 {dimension_numbers = #tpu.dot_dimension_numbers<[1], [0], [0], [1], [0, 0, 1, 1], [], []>} : vector<8x128xf32>, vector<128x512xf32>, vector<8x512xf32> -> vector<8x512xf32>
    %102 = arith.addf %100, %101 : vector<8x512xf32>
    %103 = arith.mulf %102, %14 : vector<8x512xf32>
    %104 = math.tanh %103 : vector<8x512xf32>
    %105 = arith.mulf %104, %14 : vector<8x512xf32>
    %106 = arith.addf %105, %17 : vector<8x512xf32>
    %107 = vector.extract_strided_slice %106 {offsets = [0, 0], sizes = [8, 128], strides = [1, 1]} : vector<8x512xf32> to vector<8x128xf32>
    %108 = vector.extract_strided_slice %106 {offsets = [0, 128], sizes = [8, 128], strides = [1, 1]} : vector<8x512xf32> to vector<8x128xf32>
    %109 = vector.extract_strided_slice %106 {offsets = [0, 256], sizes = [8, 128], strides = [1, 1]} : vector<8x512xf32> to vector<8x128xf32>
    %110 = vector.extract_strided_slice %106 {offsets = [0, 384], sizes = [8, 128], strides = [1, 1]} : vector<8x512xf32> to vector<8x128xf32>
    %111 = arith.mulf %108, %97 : vector<8x128xf32>
    %112 = arith.mulf %107, %110 : vector<8x128xf32>
    %113 = arith.addf %111, %112 : vector<8x128xf32>
    %114 = math.tanh %113 : vector<8x128xf32>
    %115 = arith.mulf %109, %114 : vector<8x128xf32>
    %c0_17 = arith.constant 0 : index
    %c0_18 = arith.constant 0 : index
    %116 = vector.load %arg3[%c0_17, %c0_18] : memref<128x128xf32, #tpu.memory_space<vmem>>, vector<128x128xf32>
    %cst_19 = arith.constant dense<0.000000e+00> : vector<8x128xf32>
    %117 = tpu.matmul %115, %116, %cst_19 {dimension_numbers = #tpu.dot_dimension_numbers<[1], [0], [0], [1], [0, 0, 1, 1], [], []>} : vector<8x128xf32>, vector<128x128xf32>, vector<8x128xf32> -> vector<8x128xf32>
    %c0_20 = arith.constant 0 : index
    %c0_21 = arith.constant 0 : index
    %118 = vector.load %arg4[%c0_20, %c0_21] : memref<1x128xf32, #tpu.memory_space<vmem>>, vector<1x128xf32>
    %119 = vector.broadcast %118 : vector<1x128xf32> to vector<8x128xf32>
    %120 = arith.addf %117, %119 : vector<8x128xf32>
    %c0_22 = arith.constant 0 : index
    %c0_23 = arith.constant 0 : index
    %121 = vector.load %arg5[%c0_22, %c0_23] : memref<8x128xf32, #tpu.memory_space<vmem>>, vector<8x128xf32>
    tpu.vector_store %arg5[%c0_22, %c0_23], %120 {strides = array<i32>} : memref<8x128xf32, #tpu.memory_space<vmem>>, vector<8x128xf32>,
    return
  }
}

</mosaic_0001>

<bundles_post_ra>
// kernel: lstm_forward.1
= control target key start
LH: loop header
LB: loop body
LE: loop exit
PB: predicated region body
PF: predicated region fallthrough
CT: control target
= control target key end

     0   :  { %10 = vsyncpa [#allocation3], 0  ;;  %s2627_s0 = inlined_call_operand.vmem [shape: s32[48,1], index: 0, kind: input, shape index: {}]   ;;  %s2628_s1 = inlined_call_operand.vmem [shape: f32[15,512], index: 1, kind: input, shape index: {}]   ;;  %s2629_s2 = inlined_call_operand.hbm [shape: f32[128,512], index: 2, kind: input, shape index: {}]   ;;  %s2630_s3 = inlined_call_operand.hbm [shape: f32[128,128], index: 3, kind: input, shape index: {}]   ;;  %s2631_s4 = inlined_call_operand.vmem [shape: f32[1,128], index: 4, kind: input, shape index: {}]   ;;  %s2632_s5 = inlined_call_operand.vmem [shape: f32[8,128], index: 5, kind: output, shape index: {}]  }
   0x1   :  { %11 = vsyncpa [#allocation5], 0  ;;  %s2155_s18 = smov [#allocation2]   ;;  %s2107_s22 = scalar_lea.hbm %s2629_s2, 8192 }
   0x2   :  { %s21_s19 = sshll.u32 %s2155_s18, 4  ;;  %p2108_p0 = scmp.ne.s32.totalorder %s2629_s2, %s2107_s22  ;;  %s22_s19 = int_to_ptr.vmem [resolvable:$true] %s21_s19 }
   0x3   :  { %p2111_p1 = scmp.lt.u32.totalorder %s2107_s22, %s2629_s2 }
   0x5   :  { %p2113_p2 = pnand %p2111_p1, %p2108_p0 }
   0x7   :  { %2116 = shalt.err (!%p2113_p2)
}
   0x8   :  { %s2117_s27 = scalar_lea.vmem %s22_s19, 8192  ;;  %p2122_p4 = scmp.lt.s32.totalorder %s22_s19, %s22_s19 }
   0x9   :  { %p2118_p3 = scmp.ne.s32.totalorder %s22_s19, %s2117_s27  ;;  %p2123_p5 = scmp.lt.s32.totalorder %s2117_s27, %s2117_s27 }
   0xb   :  { %p2124_p6 = por %p2123_p5, %p2122_p4 }
   0xd   :  { %p2125_p7 = pnand %p2124_p6, %p2118_p3 }
   0xf   :  { %2128 = shalt.err (!%p2125_p7)
}
  0x10   :  { %s2156_s28 = smov 512   ;;  %s2157_s29 = smov 32  }
  0x11   :  { %27 = dma.hbm_to_vmem [thread:$0]  %s2629_s2, 8192, %s22_s19, [#allocation3], %s2156_s28, %s2156_s28, %s2157_s29  }
  0x12   :  { %s2158_s7 = smov [#allocation4]   ;;  %s2129_s11 = scalar_lea.hbm %s2630_s3, 2048 }
  0x13   :  { %s33_s8 = sshll.u32 %s2158_s7, 4  ;;  %p2130_p8 = scmp.ne.s32.totalorder %s2630_s3, %s2129_s11  ;;  %s34_s8 = int_to_ptr.vmem [resolvable:$true] %s33_s8 }
  0x14   :  { %p2133_p9 = scmp.lt.u32.totalorder %s2129_s11, %s2630_s3 }
  0x16   :  { %p2135_p10 = pnand %p2133_p9, %p2130_p8 }
  0x18   :  { %2138 = shalt.err (!%p2135_p10)
}
  0x19   :  { %s2139_s16 = scalar_lea.vmem %s34_s8, 2048  ;;  %p2144_p12 = scmp.lt.s32.totalorder %s34_s8, %s34_s8 }
  0x1a   :  { %p2140_p11 = scmp.ne.s32.totalorder %s34_s8, %s2139_s16  ;;  %p2145_p13 = scmp.lt.s32.totalorder %s2139_s16, %s2139_s16 }
  0x1c   :  { %p2146_p0 = por %p2145_p13, %p2144_p12 }
  0x1e   :  { %p2147_p1 = pnand %p2146_p0, %p2140_p11 }
  0x20   :  { %2150 = shalt.err (!%p2147_p1)
}
  0x21   :  { %s2159_s2 = smov 128   ;;  %s2160_s17 = smov 8  }
  0x22   :  { %39 = dma.hbm_to_vmem [thread:$0]  %s2630_s3, 2048, %s34_s8, [#allocation5], %s2159_s2, %s2159_s2, %s2160_s17  }
  0x23   :  { %2151 = dma.done.wait [#allocation3], 8192  }
  0x24   :  { %2152 = vsyncadd [#allocation3], 4294959104 }
  0x25   :  { %2153 = dma.done.wait [#allocation5], 2048  }
  0x26   :  { %2154 = vsyncadd [#allocation5], 4294965248  ;;  %v2161_v0 = vmov 0   ;;  %v2162_v1 = vmov 0.0   ;;  %v50_v2 = vld [vmem:[%s2627_s0 + $0x10] sm:$0xff]  ;;  %v48_v3 = vld [vmem:[%s2627_s0] sm:$0xff] }
  0x27   :  { %2046 = vset.pattern.permute.xlu1 %v2161_v0  ;;  %2045 = vset.pattern.permute.xlu0 %v2161_v0  ;;  %v51_v4 = vld [vmem:[%s2627_s0 + $0x18] sm:$0xff]  ;;  %v49_v5 = vld [vmem:[%s2627_s0 + $0x8] sm:$0xff]  ;;  %v334_v8 = vld [vmem:[#allocation2] sm:$0xff]  ;;  %vm119_vm0 = vcmask 1046528   ;;  %vm2163_vm1 = vmmov 1   ;;  %vm100_vm3 = vcmask 121856  }
  0x28   :  { %196 = vmatprep.mubr.f32.mxu1 %v2162_v1  ;;  %477 = vmatprep.mubr.f32.mxu0 %v2162_v1  ;;  %v335_v6 = vld [vmem:[#allocation2 + $0x8] sm:$0xff]  ;;  %v338_v10 = vld [vmem:[#allocation2 + $0x20] sm:$0xff]  ;;  %vm2253_vm2 = vmpackc.low %vm119_vm0, %vm2163_vm1  ;;  %vm2165_vm10 = vmmov 0  }
  0x29   :  { %63 = vperm.xlu1 %2046, %v50_v2   ;;  %57 = vperm.xlu0 %2045, %v48_v3   ;;  %v339_v7 = vld [vmem:[#allocation2 + $0x28] sm:$0xff]  ;;  %v2236_v13 = vpack.c.bf16 %v338_v10, %v334_v8  ;;  %v342_v15 = vld [vmem:[#allocation2 + $0x40] sm:$0xff]  ;;  %v95_v40 = vld [vmem:[%s2628_s1 + $0x18] sm:$0xff]  ;;  %v54_v3 = vlaneseq }
  0x2a   :  { %v2234_v9 = vpack.c.bf16 %v339_v7, %v335_v6  ;;  %v343_v11 = vld [vmem:[#allocation2 + $0x48] sm:$0xff]  ;;  %v346_v16 = vld [vmem:[#allocation2 + $0x60] sm:$0xff]  ;;  %v99_v41 = vld [vmem:[%s2628_s1 + $0x38] sm:$0x7f] }
  0x2b   :  { %v347_v12 = vld [vmem:[#allocation2 + $0x68] sm:$0xff]  ;;  %v52_v20 = vld [vmem:[%s2627_s0 + $0x20] sm:$0xff]  ;;  %v2248_v21 = vpack.c.bf16 %v346_v16, %v342_v15  ;;  %v1596_v43 = vpack.c.bf16 %v99_v41, %v95_v40  ;;  %v98_v6 = vld [vmem:[%s2628_s1 + $0x30] sm:$0x7f] }
  0x2c   :  { %v2238_v14 = vpack.c.bf16 %v347_v12, %v343_v11  ;;  %v351_v17 = vld [vmem:[#allocation2 + $0x88] sm:$0xff]  ;;  %1603 = vmatprep.subr.bf16.mxu0 %v2234_v9  ;;  %v350_v23 = vld [vmem:[#allocation2 + $0x80] sm:$0xff]  ;;  %v337_v7 = vld [vmem:[#allocation2 + $0x18] sm:$0xff] }
  0x2d   :  { %66 = vperm.xlu1 %2046, %v51_v4   ;;  %60 = vperm.xlu0 %2045, %v49_v5   ;;  %v355_v18 = vld [vmem:[#allocation2 + $0xa8] sm:$0xff]  ;;  %v354_v24 = vld [vmem:[#allocation2 + $0xa0] sm:$0xff]  ;;  %v55_v4 = vand.u32 127, %v54_v3  ;;  %v94_v5 = vld [vmem:[%s2628_s1 + $0x10] sm:$0xff] }
  0x2e   :  { %v53_v19 = vld [vmem:[%s2627_s0 + $0x28] sm:$0xff]  ;;  %1605 = vmatpush1.bf16.msra.mxu0 %v2236_v13  ;;  %v2251_v22 = vpack.c.bf16 %v355_v18, %v351_v17  ;;  %v2258_v28 = vpack.c.bf16 %v354_v24, %v350_v23  ;;  %v358_v29 = vld [vmem:[#allocation2 + $0xc0] sm:$0xff]  ;;  %v341_v8 = vld [vmem:[#allocation2 + $0x38] sm:$0xff]  ;;  %v1599_v11 = vpack.c.bf16 %v98_v6, %v94_v5 }
  0x2f   :  { %1607 = vmatprep.subr.bf16.mxu0 %v2238_v14  ;;  %v359_v25 = vld [vmem:[#allocation2 + $0xc8] sm:$0xff]  ;;  %v362_v33 = vld [vmem:[#allocation2 + $0xe0] sm:$0xff]  ;;  %v2341_v12 = vpack.c.bf16 %v341_v8, %v337_v7  ;;  %v336_v27 = vld [vmem:[#allocation2 + $0x10] sm:$0xff] }
  0x30   :  { %v363_v26 = vld [vmem:[#allocation2 + $0xe8] sm:$0xff]  ;;  %v92_v35 = vld [vmem:[%s2628_s1] sm:$0xff]  ;;  %v2284_v42 = vpack.c.bf16 %v362_v33, %v358_v29  ;;  %v340_v29 = vld [vmem:[#allocation2 + $0x30] sm:$0xff] }
  0x31   :  { %72 = vperm.xlu1 %2046, %v53_v19   ;;  %69 = vperm.xlu0 %2045, %v52_v20   ;;  %v93_v30 = vld [vmem:[%s2628_s1 + $0x8] sm:$0xff]  ;;  %v2267_v32 = vpack.c.bf16 %v363_v26, %v359_v25  ;;  %v96_v36 = vld [vmem:[%s2628_s1 + $0x20] sm:$0x7f]  ;;  %v349_v33 = vld [vmem:[#allocation2 + $0x78] sm:$0xff] }
  0x32   :  { %1609 = vmatpush1.bf16.msra.mxu0 %v2248_v21  ;;  %v97_v31 = vld [vmem:[%s2628_s1 + $0x28] sm:$0x7f]  ;;  %v1593_v39 = vpack.c.bf16 %v96_v36, %v92_v35  ;;  %v366_v45 = vld [vmem:[#allocation2 + $0x100] sm:$0xff]  ;;  %v344_v36 = vld [vmem:[#allocation2 + $0x50] sm:$0xff] }
  0x33   :  { %1611 = vmatprep.subr.bf16.mxu0 %v2251_v22  ;;  %v1590_v34 = vpack.c.bf16 %v97_v31, %v93_v30  ;;  %v367_v37 = vld [vmem:[#allocation2 + $0x108] sm:$0xff]  ;;  %v370_v46 = vld [vmem:[#allocation2 + $0x120] sm:$0xff]  ;;  %v345_v31 = vld [vmem:[#allocation2 + $0x58] sm:$0xff] }
  0x34   :  { %v371_v38 = vld [vmem:[#allocation2 + $0x128] sm:$0xff]  ;;  %v2294_v49 = vpack.c.bf16 %v370_v46, %v366_v45  ;;  %v374_v51 = vld [vmem:[#allocation2 + $0x140] sm:$0xff]  ;;  %v2366_v35 = vpack.c.bf16 %v349_v33, %v345_v31  ;;  %v356_v45 = vld [vmem:[#allocation2 + $0xb0] sm:$0xff] }
  0x35   :  { %1592 = vmatprep.subr.msk.bf16.mxu1 %vm2253_vm2, %v1590_v34  ;;  %v2289_v44 = vpack.c.bf16 %v371_v38, %v367_v37  ;;  %v375_v47 = vld [vmem:[#allocation2 + $0x148] sm:$0xff]  ;;  %v378_v52 = vld [vmem:[#allocation2 + $0x160] sm:$0xff]  ;;  %v2364_v34 = vpack.c.bf16 %v340_v29, %v336_v27  ;;  %v348_v37 = vld [vmem:[#allocation2 + $0x70] sm:$0xff] }
  0x36   :  { %1613 = vmatpush1.bf16.msra.mxu0 %v2258_v28  ;;  %1595 = vmatpush1.bf16.msk.msra.mxu1 %vm2253_vm2, %v1593_v39  ;;  %v379_v48 = vld [vmem:[#allocation2 + $0x168] sm:$0xff]  ;;  %v2300_v55 = vpack.c.bf16 %v378_v52, %v374_v51  ;;  %v382_v57 = vld [vmem:[#allocation2 + $0x180] sm:$0xff]  ;;  %v353_v38 = vld [vmem:[#allocation2 + $0x98] sm:$0xff]  ;;  %v2371_v40 = vpack.c.bf16 %v348_v37, %v344_v36 }
  0x37   :  { %1615 = vmatprep.subr.bf16.mxu0 %v2267_v32  ;;  %1598 = vmatprep.subr.msk.bf16.mxu1 %vm2253_vm2, %v1596_v43  ;;  %v2297_v50 = vpack.c.bf16 %v379_v48, %v375_v47  ;;  %v383_v53 = vld [vmem:[#allocation2 + $0x188] sm:$0xff]  ;;  %v386_v58 = vld [vmem:[#allocation2 + $0x1a0] sm:$0xff]  ;;  %v357_v39 = vld [vmem:[#allocation2 + $0xb8] sm:$0xff] }
  0x38   :  { %v387_v54 = vld [vmem:[#allocation2 + $0x1a8] sm:$0xff]  ;;  %v2306_v61 = vpack.c.bf16 %v386_v58, %v382_v57  ;;  %v390_v63 = vld [vmem:[#allocation2 + $0x1c0] sm:$0xff]  ;;  %v2374_v41 = vpack.c.bf16 %v357_v39, %v353_v38  ;;  %v352_v43 = vld [vmem:[#allocation2 + $0x90] sm:$0xff] }
  0x39   :  { %v2303_v56 = vpack.c.bf16 %v387_v54, %v383_v53  ;;  %v391_v59 = vld [vmem:[#allocation2 + $0x1c8] sm:$0xff]  ;;  %v394_v0 = vld [vmem:[#allocation2 + $0x1e0] sm:$0xff]  ;;  %v361_v46 = vld [vmem:[#allocation2 + $0xd8] sm:$0xff]  ;;  %v2379_v48 = vpack.c.bf16 %v356_v45, %v352_v43 }
  0x3a   :  { %1617 = vmatpush1.bf16.msra.mxu0 %v2284_v42  ;;  %v395_v60 = vld [vmem:[#allocation2 + $0x1e8] sm:$0xff]  ;;  %v2312_v2 = vpack.c.bf16 %v394_v0, %v390_v63  ;;  %v365_v47 = vld [vmem:[#allocation2 + $0xf8] sm:$0xff]  ;;  %v360_v52 = vld [vmem:[#allocation2 + $0xd0] sm:$0xff] }
  0x3b   :  { %1619 = vmatprep.subr.bf16.mxu0 %v2289_v44  ;;  %v2309_v62 = vpack.c.bf16 %v395_v60, %v391_v59  ;;  %v2382_v51 = vpack.c.bf16 %v365_v47, %v361_v46  ;;  %v364_v53 = vld [vmem:[#allocation2 + $0xf0] sm:$0xff]  ;;  %v369_v54 = vld [vmem:[#allocation2 + $0x118] sm:$0xff] }
  0x3c   :  { %v373_v57 = vld [vmem:[#allocation2 + $0x138] sm:$0xff]  ;;  %v2387_v58 = vpack.c.bf16 %v364_v53, %v360_v52  ;;  %v368_v60 = vld [vmem:[#allocation2 + $0x110] sm:$0xff] }
  0x3d   :  { %v2390_v59 = vpack.c.bf16 %v373_v57, %v369_v54  ;;  %v372_v63 = vld [vmem:[#allocation2 + $0x130] sm:$0xff]  ;;  %v377_v0 = vld [vmem:[#allocation2 + $0x158] sm:$0xff] }
  0x3e   :  { %1621 = vmatpush1.bf16.msra.mxu0 %v2294_v49  ;;  %v381_v3 = vld [vmem:[#allocation2 + $0x178] sm:$0xff]  ;;  %v376_v6 = vld [vmem:[#allocation2 + $0x150] sm:$0xff] }
  0x3f   :  { %1623 = vmatprep.subr.bf16.mxu0 %v2297_v50  ;;  %v2398_v5 = vpack.c.bf16 %v381_v3, %v377_v0  ;;  %v380_v7 = vld [vmem:[#allocation2 + $0x170] sm:$0xff]  ;;  %v385_v8 = vld [vmem:[#allocation2 + $0x198] sm:$0xff] }
  0x42   :  { %1625 = vmatpush1.bf16.msra.mxu0 %v2300_v55 }
  0x43   :  { %1627 = vmatprep.subr.bf16.mxu0 %v2303_v56 }
  0x46   :  { %1629 = vmatpush1.bf16.msra.mxu0 %v2306_v61 }
  0x47   :  { %1631 = vmatprep.subr.bf16.mxu0 %v2309_v62 }
  0x4a   :  { %1633 = vmatpush1.bf16.msra.mxu0 %v2312_v2 }
  0x4b   :  { %1667 = vmatprep.subr.bf16.mxu0 %v2234_v9 }
  0x4d   :  { %478 = vmatmul.mubr.f32.vlgmr.msra.gmra.mrb[0].mxu0 %v2162_v1 }
  0x4e   :  { %1669 = vmatpush1.bf16.msra.mxu0 %v2236_v13  ;;  %644 = vmatprep.mubr.f32.mxu0 %v2162_v1 }
  0x4f   :  { %1671 = vmatprep.subr.bf16.mxu0 %v2238_v14 }
  0x52   :  { %1673 = vmatpush1.bf16.msra.mxu0 %v2248_v21 }
  0x53   :  { %1675 = vmatprep.subr.bf16.mxu0 %v2251_v22 }
  0x56   :  { %1677 = vmatpush1.bf16.msra.mxu0 %v2258_v28 }
  0x57   :  { %1679 = vmatprep.subr.bf16.mxu0 %v2267_v32 }
  0x5a   :  { %1681 = vmatpush1.bf16.msra.mxu0 %v2284_v42 }
  0x5b   :  { %1683 = vmatprep.subr.bf16.mxu0 %v2289_v44 }
  0x5e   :  { %1685 = vmatpush1.bf16.msra.mxu0 %v2294_v49 }
  0x5f   :  { %1687 = vmatprep.subr.bf16.mxu0 %v2297_v50 }
  0x62   :  { %1689 = vmatpush1.bf16.msra.mxu0 %v2300_v55 }
  0x63   :  { %1691 = vmatprep.subr.bf16.mxu0 %v2303_v56 }
  0x66   :  { %1693 = vmatpush1.bf16.msra.mxu0 %v2306_v61 }
  0x67   :  { %1695 = vmatprep.subr.bf16.mxu0 %v2309_v62 }
  0x6a   :  { %1697 = vmatpush1.bf16.msra.mxu0 %v2312_v2 }
  0x6b   :  { %1731 = vmatprep.subr.bf16.mxu0 %v2234_v9 }
  0xa8   :  { %v58_v10 = vpop.permute.xlu0 %57  ;;  %v64_v16 = vpop.permute.xlu1 %63 }
  0xa9   :  { %vm74_vm4 = vcmp.eq.s32.totalorder %v58_v10, %v55_v4  ;;  %vm76_vm5 = vcmp.eq.s32.totalorder %v64_v16, %v55_v4  ;;  %v389_v10 = vld [vmem:[#allocation2 + $0x1b8] sm:$0xff]  ;;  %v384_v16 = vld [vmem:[#allocation2 + $0x190] sm:$0xff] }
  0xaa   :  { %v1515_v15 = vsel %vm74_vm4, 1.0, %v2162_v1  ;;  %v1517_v19 = vsel %vm76_vm5, 1.0, %v2162_v1 }
  0xab   :  { %1523 = vmatmul.mubr.msk.f32.vlgmr.msra.gmra.mrb[0].mxu1 %vm100_vm3, %v1515_v15 }
  0xac   :  { %1601 = vmatpush1.bf16.msk.msra.mxu1 %vm2253_vm2, %v1599_v11  ;;  %v61_v17 = vpop.permute.xlu0 %60  ;;  %202 = vmatprep.mubr.f32.mxu1 %v2162_v1  ;;  %v67_v20 = vpop.permute.xlu1 %66  ;;  %v2403_v11 = vpack.c.bf16 %v380_v7, %v376_v6 }
  0xad   :  { %vm75_vm6 = vcmp.eq.s32.totalorder %v61_v17, %v55_v4  ;;  %1635 = vmatprep.subr.bf16.mxu1 %v2341_v12  ;;  %vm77_vm7 = vcmp.eq.s32.totalorder %v67_v20, %v55_v4  ;;  %v388_v17 = vld [vmem:[#allocation2 + $0x1b0] sm:$0xff] }
  0xae   :  { %v1516_v18 = vsel %vm75_vm6, 1.0, %v2162_v1  ;;  %v1518_v24 = vsel %vm77_vm7, 1.0, %v2162_v1  ;;  %v2410_v20 = vpack.c.bf16 %v388_v17, %v384_v16 }
  0xaf   :  { %1524 = vmatmul.mubr.msk.f32.gmra.mrb[2].mxu1 %vm100_vm3, %v1516_v18 }
  0xb0   :  { %208 = vmatprep.mubr.f32.mxu1 %v2162_v1  ;;  %v70_v23 = vpop.permute.xlu0 %69  ;;  %v73_v25 = vpop.permute.xlu1 %72 }
  0xb1   :  { %vm78_vm8 = vcmp.eq.s32.totalorder %v70_v23, %v55_v4  ;;  %vm79_vm9 = vcmp.eq.s32.totalorder %v73_v25, %v55_v4  ;;  %v2395_v4 = vpack.c.bf16 %v372_v63, %v368_v60  ;;  %v396_v25 = vld [vmem:[#allocation2 + $0x1f0] sm:$0xff] }
  0xb2   :  { %v1519_v26 = vsel %vm78_vm8, 1.0, %v2162_v1  ;;  %v1520_v30 = vsel %vm79_vm9, 1.0, %v2162_v1 }
  0xb3   :  { %1525 = vmatmul.mubr.msk.f32.gmra.mrb[4].mxu1 %vm100_vm3, %v1517_v19 }
  0xb4   :  { %214 = vmatprep.mubr.f32.mxu1 %v2162_v1 }
  0xb7   :  { %1526 = vmatmul.mubr.msk.f32.gmra.mrb[6].mxu1 %vm100_vm3, %v1518_v24 }
  0xb8   :  { %220 = vmatprep.mubr.f32.mxu1 %v2162_v1 }
  0xbb   :  { %1527 = vmatmul.mubr.msk.f32.gmra.mrb[8].mxu1 %vm100_vm3, %v1519_v26 }
  0xbc   :  { %226 = vmatprep.mubr.f32.mxu1 %v2162_v1 }
  0xbf   :  { %1528 = vmatmul.mubr.msk.f32.gmra.mrb[10].mxu1 %vm100_vm3, %v1520_v30 }
  0xc0   :  { %297 = vmatprep.mubr.f32.mxu1 %v2162_v1 }
  0xc3   :  { %1531 = vmatmul.mubr.msk.f32.vlgmr.msra.gmra.mrb[12].mxu1 %vm100_vm3, %v1515_v15  ;;  %v2406_v15 = vpack.c.bf16 %v389_v10, %v385_v8 }
  0xc4   :  { %1637 = vmatpush1.bf16.msra.mxu1 %v2364_v34  ;;  %303 = vmatprep.mubr.f32.mxu1 %v2162_v1 }
  0xc5   :  { %1639 = vmatprep.subr.bf16.mxu1 %v2366_v35 }
  0xc7   :  { %1532 = vmatmul.mubr.msk.f32.gmra.mrb[14].mxu1 %vm100_vm3, %v1516_v18  ;;  %v393_v18 = vld [vmem:[#allocation2 + $0x1d8] sm:$0xff] }
  0xc8   :  { %1641 = vmatpush1.bf16.msra.mxu1 %v2371_v40  ;;  %309 = vmatprep.mubr.f32.mxu1 %v2162_v1 }
  0xc9   :  { %1643 = vmatprep.subr.bf16.mxu1 %v2374_v41 }
  0xcb   :  { %1533 = vmatmul.mubr.msk.f32.gmra.mrb[16].mxu1 %vm100_vm3, %v1517_v19  ;;  %v397_v19 = vld [vmem:[#allocation2 + $0x1f8] sm:$0xff] }
  0xcc   :  { %1645 = vmatpush1.bf16.msra.mxu1 %v2379_v48  ;;  %315 = vmatprep.mubr.f32.mxu1 %v2162_v1  ;;  %v2414_v23 = vpack.c.bf16 %v397_v19, %v393_v18 }
  0xcd   :  { %1647 = vmatprep.subr.bf16.mxu1 %v2382_v51 }
  0xcf   :  { %1534 = vmatmul.mubr.msk.f32.gmra.mrb[18].mxu1 %vm100_vm3, %v1518_v24  ;;  %v392_v24 = vld [vmem:[#allocation2 + $0x1d0] sm:$0xff] }
  0xd0   :  { %1649 = vmatpush1.bf16.msra.mxu1 %v2387_v58  ;;  %321 = vmatprep.mubr.f32.mxu1 %v2162_v1 }
  0xd1   :  { %1651 = vmatprep.subr.bf16.mxu1 %v2390_v59 }
  0xd3   :  { %1535 = vmatmul.mubr.msk.f32.gmra.mrb[20].mxu1 %vm100_vm3, %v1519_v26  ;;  %v2417_v26 = vpack.c.bf16 %v396_v25, %v392_v24 }
  0xd4   :  { %1653 = vmatpush1.bf16.msra.mxu1 %v2395_v4  ;;  %327 = vmatprep.mubr.f32.mxu1 %v2162_v1 }
  0xd5   :  { %1655 = vmatprep.subr.bf16.mxu1 %v2398_v5 }
  0xd7   :  { %1536 = vmatmul.mubr.msk.f32.gmra.mrb[22].mxu1 %vm100_vm3, %v1520_v30 }
  0xd8   :  { %1657 = vmatpush1.bf16.msra.mxu1 %v2403_v11  ;;  %548 = vmatprep.mubr.f32.mxu1 %v2162_v1 }
  0xd9   :  { %1659 = vmatprep.subr.bf16.mxu1 %v2406_v15 }
  0xdc   :  { %1661 = vmatpush1.bf16.msra.mxu1 %v2410_v20 }
  0xdd   :  { %1663 = vmatprep.subr.bf16.mxu1 %v2414_v23 }
  0xe0   :  { %1665 = vmatpush1.bf16.msra.mxu1 %v2417_v26 }
  0xe1   :  { %1699 = vmatprep.subr.bf16.mxu1 %v2341_v12 }
  0xe3   :  { %549 = vmatmul.mubr.f32.vlgmr.msra.gmra.mrb[12].mxu1 %v2162_v1 }
  0xe4   :  { %1701 = vmatpush1.bf16.msra.mxu1 %v2364_v34  ;;  %715 = vmatprep.mubr.f32.mxu1 %v2162_v1 }
  0xe5   :  { %1703 = vmatprep.subr.bf16.mxu1 %v2366_v35 }
  0xe8   :  { %1705 = vmatpush1.bf16.msra.mxu1 %v2371_v40 }
  0xe9   :  { %1707 = vmatprep.subr.bf16.mxu1 %v2374_v41 }
  0xec   :  { %1709 = vmatpush1.bf16.msra.mxu1 %v2379_v48 }
  0xed   :  { %1711 = vmatprep.subr.bf16.mxu1 %v2382_v51 }
  0xf0   :  { %1713 = vmatpush1.bf16.msra.mxu1 %v2387_v58 }
  0xf1   :  { %1715 = vmatprep.subr.bf16.mxu1 %v2390_v59 }
  0xf4   :  { %1717 = vmatpush1.bf16.msra.mxu1 %v2395_v4 }
  0xf5   :  { %1719 = vmatprep.subr.bf16.mxu1 %v2398_v5 }
  0xf8   :  { %1721 = vmatpush1.bf16.msra.mxu1 %v2403_v11 }
  0xf9   :  { %1723 = vmatprep.subr.bf16.mxu1 %v2406_v15 }
  0xfc   :  { %1725 = vmatpush1.bf16.msra.mxu1 %v2410_v20 }
  0xfd   :  { %1727 = vmatprep.subr.bf16.mxu1 %v2414_v23 }
 0x100   :  { %1729 = vmatpush1.bf16.msra.mxu1 %v2417_v26 }
 0x101   :  { %1763 = vmatprep.subr.bf16.mxu1 %v2341_v12 }
 0x120   :  { %v479_v27 = vpop.f32.mrb[0].mxu0 }
 0x121   :  { %v481_v29 = vpop.f32.mrb[1].mxu0 }
 0x17e   :  { %v198_v30 = vpop.f32.mrb[0].mxu1 }
 0x17f   :  { %v555_v31 = vadd.f32 %v479_v27, %v198_v30  ;;  %v200_v33 = vpop.f32.mrb[1].mxu1 }
 0x180   :  { %v556_v36 = vadd.f32 %v481_v29, %v200_v33 }
 0x181   :  { %v559_v60 = vmul.f32 0.5, %v555_v31 }
 0x182   :  { %v2440_v37 = vpop.f32.mrb[2].mxu1  ;;  %v560_v57 = vmul.f32 0.5, %v556_v36 }
 0x183   :  { %v2442_v38 = vpop.f32.mrb[3].mxu1 }
 0x184   :  { %2047 = vtanh.f32 %v560_v57 }
 0x185   :  { %2049 = vtanh.f32 %v559_v60 }
 0x186   :  { %v2444_v39 = vpop.f32.mrb[4].mxu1 }
 0x187   :  { %v2446_v43 = vpop.f32.mrb[5].mxu1 }
 0x18a   :  { %v2448_v45 = vpop.f32.mrb[6].mxu1 }
 0x18b   :  { %v2450_v46 = vpop.f32.mrb[7].mxu1 }
 0x18e   :  { %v2452_v47 = vpop.f32.mrb[8].mxu1  ;;  %v2048_v3 = vpop.eup %2047 }
 0x18f   :  { %v2454_v52 = vpop.f32.mrb[9].mxu1  ;;  %v2050_v6 = vpop.eup %2049  ;;  %v568_v7 = vmul.f32 0.5, %v2048_v3 }
 0x190   :  { %v567_v10 = vmul.f32 0.5, %v2050_v6 }
 0x191   :  { %v572_v16 = vadd.f32 0.5, %v568_v7 }
 0x192   :  { %v2456_v53 = vpop.f32.mrb[10].mxu1  ;;  %v571_v17 = vadd.f32 0.5, %v567_v10 }
 0x193   :  { %v2458_v54 = vpop.f32.mrb[11].mxu1  ;;  %v575_v19 = vmul.f32 0.0, %v572_v16 }
 0x1b6   :  { %v550_v63 = vpop.f32.mrb[12].mxu1 }
 0x1b7   :  { %v552_v0 = vpop.f32.mrb[13].mxu1  ;;  %v561_v8 = vmul.f32 0.5, %v550_v63 }
 0x1b8   :  { %2051 = vtanh.f32 %v552_v0 }
 0x1b9   :  { %2053 = vtanh.f32 %v561_v8 }
 0x1c2   :  { %v2052_v18 = vpop.eup %2051 }
 0x1c3   :  { %v576_v24 = vmul.f32 %v2052_v18, %v571_v17  ;;  %v2054_v27 = vpop.eup %2053 }
 0x1c4   :  { %v569_v29 = vmul.f32 0.5, %v2054_v27 }
 0x1c5   :  { %v2460_v25 = vadd.f32 %v576_v24, %v575_v19 }
 0x1c6   :  { %v573_v30 = vadd.f32 0.5, %v569_v29 }
 0x1c7   :  { %2055 = vtanh.f32 %v2460_v25 }
 0x1d1   :  { %v2056_v31 = vpop.eup %2055 }
 0x1d2   :  { %v579_v33 = vmul.f32 %v2056_v31, %v573_v30 }
 0x1d4   :  { %645 = vmatmul.mubr.f32.vlgmr.msra.gmra.mrb[2].mxu0 %v579_v33  ;;  %716 = vmatmul.mubr.f32.vlgmr.msra.gmra.mrb[14].mxu1 %v579_v33 }
 0x1d5   :  { %1733 = vmatpush1.bf16.msra.mxu0 %v2236_v13  ;;  %1765 = vmatpush1.bf16.msra.mxu1 %v2364_v34 }
 0x1d6   :  { %1735 = vmatprep.subr.bf16.mxu0 %v2238_v14  ;;  %1767 = vmatprep.subr.bf16.mxu1 %v2366_v35 }
 0x1d7   :  { %811 = vmatprep.mubr.f32.mxu0 %v2162_v1  ;;  %882 = vmatprep.mubr.f32.mxu1 %v2162_v1 }
 0x1d9   :  { %1737 = vmatpush1.bf16.msra.mxu0 %v2248_v21  ;;  %1769 = vmatpush1.bf16.msra.mxu1 %v2371_v40 }
 0x1da   :  { %1739 = vmatprep.subr.bf16.mxu0 %v2251_v22  ;;  %1771 = vmatprep.subr.bf16.mxu1 %v2374_v41 }
 0x1dd   :  { %1741 = vmatpush1.bf16.msra.mxu0 %v2258_v28  ;;  %1773 = vmatpush1.bf16.msra.mxu1 %v2379_v48 }
 0x1de   :  { %1743 = vmatprep.subr.bf16.mxu0 %v2267_v32  ;;  %1775 = vmatprep.subr.bf16.mxu1 %v2382_v51 }
 0x1e1   :  { %1745 = vmatpush1.bf16.msra.mxu0 %v2284_v42  ;;  %1777 = vmatpush1.bf16.msra.mxu1 %v2387_v58 }
 0x1e2   :  { %1747 = vmatprep.subr.bf16.mxu0 %v2289_v44  ;;  %1779 = vmatprep.subr.bf16.mxu1 %v2390_v59 }
 0x1e5   :  { %1749 = vmatpush1.bf16.msra.mxu0 %v2294_v49  ;;  %1781 = vmatpush1.bf16.msra.mxu1 %v2395_v4 }
 0x1e6   :  { %1751 = vmatprep.subr.bf16.mxu0 %v2297_v50  ;;  %1783 = vmatprep.subr.bf16.mxu1 %v2398_v5 }
 0x1e9   :  { %1753 = vmatpush1.bf16.msra.mxu0 %v2300_v55  ;;  %1785 = vmatpush1.bf16.msra.mxu1 %v2403_v11 }
 0x1ea   :  { %1755 = vmatprep.subr.bf16.mxu0 %v2303_v56  ;;  %1787 = vmatprep.subr.bf16.mxu1 %v2406_v15 }
 0x1ed   :  { %1757 = vmatpush1.bf16.msra.mxu0 %v2306_v61  ;;  %1789 = vmatpush1.bf16.msra.mxu1 %v2410_v20 }
 0x1ee   :  { %1759 = vmatprep.subr.bf16.mxu0 %v2309_v62  ;;  %1791 = vmatprep.subr.bf16.mxu1 %v2414_v23 }
 0x1f1   :  { %1761 = vmatpush1.bf16.msra.mxu0 %v2312_v2  ;;  %1793 = vmatpush1.bf16.msra.mxu1 %v2417_v26 }
 0x1f2   :  { %1795 = vmatprep.subr.bf16.mxu0 %v2234_v9  ;;  %1827 = vmatprep.subr.bf16.mxu1 %v2341_v12 }
 0x2a7   :  { %v646_v36 = vpop.f32.mrb[2].mxu0  ;;  %v717_v57 = vpop.f32.mrb[14].mxu1 }
 0x2a8   :  { %v722_v60 = vadd.f32 %v646_v36, %v2440_v37  ;;  %v648_v63 = vpop.f32.mrb[3].mxu0  ;;  %v719_v0 = vpop.f32.mrb[15].mxu1  ;;  %v728_v8 = vmul.f32 0.5, %v717_v57 }
 0x2a9   :  { %v723_v3 = vadd.f32 %v648_v63, %v2442_v38 }
 0x2aa   :  { %v726_v6 = vmul.f32 0.5, %v722_v60 }
 0x2ab   :  { %v727_v7 = vmul.f32 0.5, %v723_v3 }
 0x2ac   :  { %2057 = vtanh.f32 %v726_v6 }
 0x2ad   :  { %2059 = vtanh.f32 %v727_v7 }
 0x2ae   :  { %2061 = vtanh.f32 %v719_v0 }
 0x2af   :  { %2063 = vtanh.f32 %v728_v8 }
 0x2b6   :  { %v2058_v10 = vpop.eup %2057 }
 0x2b7   :  { %v2060_v16 = vpop.eup %2059  ;;  %v734_v17 = vmul.f32 0.5, %v2058_v10 }
 0x2b8   :  { %v735_v18 = vmul.f32 0.5, %v2060_v16  ;;  %v2062_v24 = vpop.eup %2061 }
 0x2b9   :  { %v738_v19 = vadd.f32 0.5, %v734_v17  ;;  %v2064_v38 = vpop.eup %2063 }
 0x2ba   :  { %v739_v27 = vadd.f32 0.5, %v735_v18  ;;  %v736_v31 = vmul.f32 0.5, %v2064_v38 }
 0x2bb   :  { %v743_v29 = vmul.f32 %v2062_v24, %v738_v19 }
 0x2bc   :  { %v742_v37 = vmul.f32 %v739_v27, %v2460_v25  ;;  %v740_v33 = vadd.f32 0.5, %v736_v31 }
 0x2be   :  { %v2500_v30 = vadd.f32 %v743_v29, %v742_v37 }
 0x2c0   :  { %2065 = vtanh.f32 %v2500_v30 }
 0x2ca   :  { %v2066_v36 = vpop.eup %2065 }
 0x2cb   :  { %v746_v57 = vmul.f32 %v2066_v36, %v740_v33 }
 0x2cd   :  { %812 = vmatmul.mubr.f32.vlgmr.msra.gmra.mrb[4].mxu0 %v746_v57  ;;  %883 = vmatmul.mubr.f32.vlgmr.msra.gmra.mrb[16].mxu1 %v746_v57 }
 0x2ce   :  { %1797 = vmatpush1.bf16.msra.mxu0 %v2236_v13  ;;  %1829 = vmatpush1.bf16.msra.mxu1 %v2364_v34 }
 0x2cf   :  { %1799 = vmatprep.subr.bf16.mxu0 %v2238_v14  ;;  %1831 = vmatprep.subr.bf16.mxu1 %v2366_v35 }
 0x2d0   :  { %978 = vmatprep.mubr.f32.mxu0 %v2162_v1  ;;  %1049 = vmatprep.mubr.f32.mxu1 %v2162_v1 }
 0x2d2   :  { %1801 = vmatpush1.bf16.msra.mxu0 %v2248_v21  ;;  %1833 = vmatpush1.bf16.msra.mxu1 %v2371_v40 }
 0x2d3   :  { %1803 = vmatprep.subr.bf16.mxu0 %v2251_v22  ;;  %1835 = vmatprep.subr.bf16.mxu1 %v2374_v41 }
 0x2d6   :  { %1805 = vmatpush1.bf16.msra.mxu0 %v2258_v28  ;;  %1837 = vmatpush1.bf16.msra.mxu1 %v2379_v48 }
 0x2d7   :  { %1807 = vmatprep.subr.bf16.mxu0 %v2267_v32  ;;  %1839 = vmatprep.subr.bf16.mxu1 %v2382_v51 }
 0x2da   :  { %1809 = vmatpush1.bf16.msra.mxu0 %v2284_v42  ;;  %1841 = vmatpush1.bf16.msra.mxu1 %v2387_v58 }
 0x2db   :  { %1811 = vmatprep.subr.bf16.mxu0 %v2289_v44  ;;  %1843 = vmatprep.subr.bf16.mxu1 %v2390_v59 }
 0x2de   :  { %1813 = vmatpush1.bf16.msra.mxu0 %v2294_v49  ;;  %1845 = vmatpush1.bf16.msra.mxu1 %v2395_v4 }
 0x2df   :  { %1815 = vmatprep.subr.bf16.mxu0 %v2297_v50  ;;  %1847 = vmatprep.subr.bf16.mxu1 %v2398_v5 }
 0x2e2   :  { %1817 = vmatpush1.bf16.msra.mxu0 %v2300_v55  ;;  %1849 = vmatpush1.bf16.msra.mxu1 %v2403_v11 }
 0x2e3   :  { %1819 = vmatprep.subr.bf16.mxu0 %v2303_v56  ;;  %1851 = vmatprep.subr.bf16.mxu1 %v2406_v15 }
 0x2e6   :  { %1821 = vmatpush1.bf16.msra.mxu0 %v2306_v61  ;;  %1853 = vmatpush1.bf16.msra.mxu1 %v2410_v20 }
 0x2e7   :  { %1823 = vmatprep.subr.bf16.mxu0 %v2309_v62  ;;  %1855 = vmatprep.subr.bf16.mxu1 %v2414_v23 }
 0x2ea   :  { %1825 = vmatpush1.bf16.msra.mxu0 %v2312_v2  ;;  %1857 = vmatpush1.bf16.msra.mxu1 %v2417_v26 }
 0x2eb   :  { %1859 = vmatprep.subr.bf16.mxu0 %v2234_v9  ;;  %1891 = vmatprep.subr.bf16.mxu1 %v2341_v12 }
 0x3a0   :  { %v813_v25 = vpop.f32.mrb[4].mxu0  ;;  %v884_v60 = vpop.f32.mrb[16].mxu1 }
 0x3a1   :  { %v889_v63 = vadd.f32 %v813_v25, %v2444_v39  ;;  %v815_v0 = vpop.f32.mrb[5].mxu0  ;;  %v886_v3 = vpop.f32.mrb[17].mxu1  ;;  %v895_v10 = vmul.f32 0.5, %v884_v60 }
 0x3a2   :  { %v890_v6 = vadd.f32 %v815_v0, %v2446_v43 }
 0x3a3   :  { %v893_v7 = vmul.f32 0.5, %v889_v63 }
 0x3a4   :  { %v894_v8 = vmul.f32 0.5, %v890_v6 }
 0x3a5   :  { %2067 = vtanh.f32 %v893_v7 }
 0x3a6   :  { %2069 = vtanh.f32 %v894_v8 }
 0x3a7   :  { %2071 = vtanh.f32 %v886_v3 }
 0x3a8   :  { %2073 = vtanh.f32 %v895_v10 }
 0x3af   :  { %v2068_v16 = vpop.eup %2067 }
 0x3b0   :  { %v2070_v17 = vpop.eup %2069  ;;  %v901_v18 = vmul.f32 0.5, %v2068_v16 }
 0x3b1   :  { %v902_v19 = vmul.f32 0.5, %v2070_v17  ;;  %v2072_v27 = vpop.eup %2071 }
 0x3b2   :  { %v905_v24 = vadd.f32 0.5, %v901_v18  ;;  %v2074_v43 = vpop.eup %2073 }
 0x3b3   :  { %v906_v29 = vadd.f32 0.5, %v902_v19  ;;  %v903_v31 = vmul.f32 0.5, %v2074_v43 }
 0x3b4   :  { %v910_v37 = vmul.f32 %v2072_v27, %v905_v24 }
 0x3b5   :  { %v909_v39 = vmul.f32 %v906_v29, %v2500_v30  ;;  %v907_v33 = vadd.f32 0.5, %v903_v31 }
 0x3b7   :  { %v2540_v38 = vadd.f32 %v910_v37, %v909_v39 }
 0x3b9   :  { %2075 = vtanh.f32 %v2540_v38 }
 0x3c3   :  { %v2076_v36 = vpop.eup %2075 }
 0x3c4   :  { %v913_v57 = vmul.f32 %v2076_v36, %v907_v33  ;;  %v1421_v33 = vld [vmem:[#allocation4 + $0x30] sm:$0xff]  ;;  %v1422_v36 = vld [vmem:[#allocation4 + $0x38] sm:$0xff] }
 0x3c6   :  { %979 = vmatmul.mubr.f32.vlgmr.msra.gmra.mrb[6].mxu0 %v913_v57  ;;  %1050 = vmatmul.mubr.f32.vlgmr.msra.gmra.mrb[18].mxu1 %v913_v57  ;;  %v1996_v57 = vpack.c.bf16 %v1422_v36, %v1421_v33 }
 0x3c7   :  { %1861 = vmatpush1.bf16.msra.mxu0 %v2236_v13  ;;  %1893 = vmatpush1.bf16.msra.mxu1 %v2364_v34 }
 0x3c8   :  { %1863 = vmatprep.subr.bf16.mxu0 %v2238_v14  ;;  %1895 = vmatprep.subr.bf16.mxu1 %v2366_v35 }
 0x3c9   :  { %1145 = vmatprep.mubr.f32.mxu0 %v2162_v1  ;;  %1216 = vmatprep.mubr.f32.mxu1 %v2162_v1 }
 0x3cb   :  { %1865 = vmatpush1.bf16.msra.mxu0 %v2248_v21  ;;  %1897 = vmatpush1.bf16.msra.mxu1 %v2371_v40 }
 0x3cc   :  { %1867 = vmatprep.subr.bf16.mxu0 %v2251_v22  ;;  %1899 = vmatprep.subr.bf16.mxu1 %v2374_v41 }
 0x3cf   :  { %1869 = vmatpush1.bf16.msra.mxu0 %v2258_v28  ;;  %1901 = vmatpush1.bf16.msra.mxu1 %v2379_v48 }
 0x3d0   :  { %1871 = vmatprep.subr.bf16.mxu0 %v2267_v32  ;;  %1903 = vmatprep.subr.bf16.mxu1 %v2382_v51 }
 0x3d3   :  { %1873 = vmatpush1.bf16.msra.mxu0 %v2284_v42  ;;  %1905 = vmatpush1.bf16.msra.mxu1 %v2387_v58 }
 0x3d4   :  { %1875 = vmatprep.subr.bf16.mxu0 %v2289_v44  ;;  %1907 = vmatprep.subr.bf16.mxu1 %v2390_v59 }
 0x3d7   :  { %1877 = vmatpush1.bf16.msra.mxu0 %v2294_v49  ;;  %1909 = vmatpush1.bf16.msra.mxu1 %v2395_v4 }
 0x3d8   :  { %1879 = vmatprep.subr.bf16.mxu0 %v2297_v50  ;;  %1911 = vmatprep.subr.bf16.mxu1 %v2398_v5 }
 0x3db   :  { %1881 = vmatpush1.bf16.msra.mxu0 %v2300_v55  ;;  %1913 = vmatpush1.bf16.msra.mxu1 %v2403_v11 }
 0x3dc   :  { %1883 = vmatprep.subr.bf16.mxu0 %v2303_v56  ;;  %1915 = vmatprep.subr.bf16.mxu1 %v2406_v15 }
 0x3df   :  { %1885 = vmatpush1.bf16.msra.mxu0 %v2306_v61  ;;  %1917 = vmatpush1.bf16.msra.mxu1 %v2410_v20 }
 0x3e0   :  { %1887 = vmatprep.subr.bf16.mxu0 %v2309_v62  ;;  %1919 = vmatprep.subr.bf16.mxu1 %v2414_v23 }
 0x3e3   :  { %1889 = vmatpush1.bf16.msra.mxu0 %v2312_v2  ;;  %1921 = vmatpush1.bf16.msra.mxu1 %v2417_v26 }
 0x3e4   :  { %1923 = vmatprep.subr.bf16.mxu0 %v2234_v9  ;;  %1955 = vmatprep.subr.bf16.mxu1 %v2341_v12 }
 0x499   :  { %v980_v30 = vpop.f32.mrb[6].mxu0  ;;  %v1051_v25 = vpop.f32.mrb[18].mxu1 }
 0x49a   :  { %v1056_v60 = vadd.f32 %v980_v30, %v2448_v45  ;;  %v982_v63 = vpop.f32.mrb[7].mxu0  ;;  %v1053_v0 = vpop.f32.mrb[19].mxu1  ;;  %v1062_v8 = vmul.f32 0.5, %v1051_v25  ;;  %v1423_v30 = vld [vmem:[#allocation4 + $0x40] sm:$0xff]  ;;  %v1424_v25 = vld [vmem:[#allocation4 + $0x48] sm:$0xff] }
 0x49b   :  { %v1057_v3 = vadd.f32 %v982_v63, %v2450_v46  ;;  %v1425_v63 = vld [vmem:[#allocation4 + $0x50] sm:$0xff] }
 0x49c   :  { %v1060_v6 = vmul.f32 0.5, %v1056_v60  ;;  %v1999_v60 = vpack.c.bf16 %v1424_v25, %v1423_v30 }
 0x49d   :  { %v1061_v7 = vmul.f32 0.5, %v1057_v3 }
 0x49e   :  { %2077 = vtanh.f32 %v1060_v6  ;;  %v1427_v6 = vld [vmem:[#allocation4 + $0x60] sm:$0xff] }
 0x49f   :  { %2079 = vtanh.f32 %v1061_v7  ;;  %v1428_v7 = vld [vmem:[#allocation4 + $0x68] sm:$0xff] }
 0x4a0   :  { %2081 = vtanh.f32 %v1053_v0  ;;  %v1426_v0 = vld [vmem:[#allocation4 + $0x58] sm:$0xff] }
 0x4a1   :  { %2083 = vtanh.f32 %v1062_v8  ;;  %v2002_v3 = vpack.c.bf16 %v1426_v0, %v1425_v63  ;;  %v2005_v8 = vpack.c.bf16 %v1428_v7, %v1427_v6 }
 0x4a8   :  { %v2078_v10 = vpop.eup %2077 }
 0x4a9   :  { %v2080_v16 = vpop.eup %2079  ;;  %v1068_v17 = vmul.f32 0.5, %v2078_v10  ;;  %v1429_v10 = vld [vmem:[#allocation4 + $0x70] sm:$0xff] }
 0x4aa   :  { %v1069_v9 = vmul.f32 0.5, %v2080_v16  ;;  %v2082_v18 = vpop.eup %2081  ;;  %v1430_v16 = vld [vmem:[#allocation4 + $0x78] sm:$0xff] }
 0x4ab   :  { %v1072_v12 = vadd.f32 0.5, %v1068_v17  ;;  %v2084_v46 = vpop.eup %2083  ;;  %v2008_v17 = vpack.c.bf16 %v1430_v16, %v1429_v10 }
 0x4ac   :  { %v1073_v19 = vadd.f32 0.5, %v1069_v9  ;;  %v1070_v29 = vmul.f32 0.5, %v2084_v46 }
 0x4ad   :  { %v1077_v24 = vmul.f32 %v2082_v18, %v1072_v12 }
 0x4ae   :  { %v1076_v45 = vmul.f32 %v1073_v19, %v2540_v38  ;;  %v1074_v37 = vadd.f32 0.5, %v1070_v29  ;;  %v1420_v38 = vld [vmem:[#allocation4 + $0x28] sm:$0xff] }
 0x4b0   :  { %v1078_v27 = vadd.f32 %v1077_v24, %v1076_v45 }
 0x4b2   :  { %2085 = vtanh.f32 %v1078_v27 }
 0x4bc   :  { %v2086_v39 = vpop.eup %2085 }
 0x4bd   :  { %v1080_v43 = vmul.f32 %v2086_v39, %v1074_v37 }
 0x4bf   :  { %1146 = vmatmul.mubr.f32.vlgmr.msra.gmra.mrb[8].mxu0 %v1080_v43  ;;  %1217 = vmatmul.mubr.f32.vlgmr.msra.gmra.mrb[20].mxu1 %v1080_v43 }
 0x4c0   :  { %1925 = vmatpush1.bf16.msra.mxu0 %v2236_v13  ;;  %1957 = vmatpush1.bf16.msra.mxu1 %v2364_v34 }
 0x4c1   :  { %1927 = vmatprep.subr.bf16.mxu0 %v2238_v14  ;;  %1959 = vmatprep.subr.bf16.mxu1 %v2366_v35 }
 0x4c2   :  { %1312 = vmatprep.mubr.f32.mxu0 %v2162_v1  ;;  %1383 = vmatprep.mubr.f32.mxu1 %v2162_v1 }
 0x4c4   :  { %1929 = vmatpush1.bf16.msra.mxu0 %v2248_v21  ;;  %1961 = vmatpush1.bf16.msra.mxu1 %v2371_v40 }
 0x4c5   :  { %1931 = vmatprep.subr.bf16.mxu0 %v2251_v22  ;;  %1963 = vmatprep.subr.bf16.mxu1 %v2374_v41 }
 0x4c8   :  { %1933 = vmatpush1.bf16.msra.mxu0 %v2258_v28  ;;  %1965 = vmatpush1.bf16.msra.mxu1 %v2379_v48 }
 0x4c9   :  { %1935 = vmatprep.subr.bf16.mxu0 %v2267_v32  ;;  %1967 = vmatprep.subr.bf16.mxu1 %v2382_v51 }
 0x4cc   :  { %1937 = vmatpush1.bf16.msra.mxu0 %v2284_v42  ;;  %1969 = vmatpush1.bf16.msra.mxu1 %v2387_v58 }
 0x4cd   :  { %1939 = vmatprep.subr.bf16.mxu0 %v2289_v44  ;;  %1971 = vmatprep.subr.bf16.mxu1 %v2390_v59 }
 0x4d0   :  { %1941 = vmatpush1.bf16.msra.mxu0 %v2294_v49  ;;  %1973 = vmatpush1.bf16.msra.mxu1 %v2395_v4 }
 0x4d1   :  { %1943 = vmatprep.subr.bf16.mxu0 %v2297_v50  ;;  %1975 = vmatprep.subr.bf16.mxu1 %v2398_v5  ;;  %v1415_v5 = vld [vmem:[#allocation4] sm:$0xff] }
 0x4d4   :  { %1945 = vmatpush1.bf16.msra.mxu0 %v2300_v55  ;;  %1977 = vmatpush1.bf16.msra.mxu1 %v2403_v11  ;;  %v1416_v11 = vld [vmem:[#allocation4 + $0x8] sm:$0xff] }
 0x4d5   :  { %1947 = vmatprep.subr.bf16.mxu0 %v2303_v56  ;;  %1979 = vmatprep.subr.bf16.mxu1 %v2406_v15  ;;  %v1987_v15 = vpack.c.bf16 %v1416_v11, %v1415_v5 }
 0x4d8   :  { %1949 = vmatpush1.bf16.msra.mxu0 %v2306_v61  ;;  %1981 = vmatpush1.bf16.msra.mxu1 %v2410_v20  ;;  %v2164_v20 = vmov 0.0|0.0  }
 0x4d9   :  { %1951 = vmatprep.subr.bf16.mxu0 %v2309_v62  ;;  %1983 = vmatprep.subr.bf16.mxu1 %v2414_v23  ;;  %v1417_v23 = vld [vmem:[#allocation4 + $0x10] sm:$0xff] }
 0x4dc   :  { %1953 = vmatpush1.bf16.msra.mxu0 %v2312_v2  ;;  %1985 = vmatpush1.bf16.msra.mxu1 %v2417_v26  ;;  %v1418_v26 = vld [vmem:[#allocation4 + $0x18] sm:$0xff] }
 0x4dd   :  { %1986 = vmatprep.subr.bf16.mxu0 %v2164_v20 }
 0x592   :  { %v1147_v13 = vpop.f32.mrb[8].mxu0  ;;  %v1218_v14 = vpop.f32.mrb[20].mxu1 }
 0x593   :  { %v1223_v21 = vadd.f32 %v1147_v13, %v2452_v47  ;;  %v1149_v22 = vpop.f32.mrb[9].mxu0  ;;  %v1220_v28 = vpop.f32.mrb[21].mxu1  ;;  %v1229_v49 = vmul.f32 0.5, %v1218_v14  ;;  %v1990_v47 = vpack.c.bf16 %v1418_v26, %v1417_v23 }
 0x594   :  { %v1224_v32 = vadd.f32 %v1149_v22, %v2454_v52  ;;  %v1419_v52 = vld [vmem:[#allocation4 + $0x20] sm:$0xff] }
 0x595   :  { %v1227_v42 = vmul.f32 0.5, %v1223_v21  ;;  %v1993_v31 = vpack.c.bf16 %v1420_v38, %v1419_v52 }
 0x596   :  { %v1228_v44 = vmul.f32 0.5, %v1224_v32 }
 0x597   :  { %2087 = vtanh.f32 %v1227_v42 }
 0x598   :  { %2089 = vtanh.f32 %v1228_v44 }
 0x599   :  { %2091 = vtanh.f32 %v1220_v28 }
 0x59a   :  { %2093 = vtanh.f32 %v1229_v49 }
 0x5a1   :  { %v2088_v50 = vpop.eup %2087 }
 0x5a2   :  { %v2090_v55 = vpop.eup %2089  ;;  %v1235_v56 = vmul.f32 0.5, %v2088_v50  ;;  %v1537_v50 = vld [vmem:[%s2631_s4] ss:$0 sm:$0xff] }
 0x5a3   :  { %v1236_v61 = vmul.f32 0.5, %v2090_v55  ;;  %v2092_v2 = vpop.eup %2091 }
 0x5a4   :  { %v1239_v62 = vadd.f32 0.5, %v1235_v56  ;;  %v2094_v48 = vpop.eup %2093 }
 0x5a5   :  { %v1240_v34 = vadd.f32 0.5, %v1236_v61  ;;  %v1237_v51 = vmul.f32 0.5, %v2094_v48 }
 0x5a6   :  { %v1244_v35 = vmul.f32 %v2092_v2, %v1239_v62 }
 0x5a7   :  { %v1243_v40 = vmul.f32 %v1240_v34, %v1078_v27  ;;  %v1241_v58 = vadd.f32 0.5, %v1237_v51 }
 0x5a9   :  { %v2614_v41 = vadd.f32 %v1244_v35, %v1243_v40 }
 0x5ab   :  { %2095 = vtanh.f32 %v2614_v41 }
 0x5b5   :  { %v2096_v59 = vpop.eup %2095 }
 0x5b6   :  { %v1247_v4 = vmul.f32 %v2096_v59, %v1241_v58 }
 0x5b8   :  { %1313 = vmatmul.mubr.f32.vlgmr.msra.gmra.mrb[10].mxu0 %v1247_v4  ;;  %1384 = vmatmul.mubr.f32.vlgmr.msra.gmra.mrb[22].mxu1 %v1247_v4 }
 0x5b9   :  { %1988 = vmatpush3.bf16.msra.mxu0 %v1987_v15  ;;  %1587 = vmatprep.mubr.msk.f32.mxu0 %vm2165_vm10, %v2162_v1 }
 0x5ba   :  { %1989 = vmatprep.subr.bf16.mxu0 %v2164_v20 }
 0x5bd   :  { %1991 = vmatpush3.bf16.msra.mxu0 %v1990_v47 }
 0x5be   :  { %1992 = vmatprep.subr.bf16.mxu0 %v2164_v20 }
 0x5c1   :  { %1994 = vmatpush3.bf16.msra.mxu0 %v1993_v31 }
 0x5c2   :  { %1995 = vmatprep.subr.bf16.mxu0 %v2164_v20 }
 0x5c5   :  { %1997 = vmatpush3.bf16.msra.mxu0 %v1996_v57 }
 0x5c6   :  { %1998 = vmatprep.subr.bf16.mxu0 %v2164_v20 }
 0x5c9   :  { %2000 = vmatpush3.bf16.msra.mxu0 %v1999_v60 }
 0x5ca   :  { %2001 = vmatprep.subr.bf16.mxu0 %v2164_v20 }
 0x5cd   :  { %2003 = vmatpush3.bf16.msra.mxu0 %v2002_v3 }
 0x5ce   :  { %2004 = vmatprep.subr.bf16.mxu0 %v2164_v20 }
 0x5d1   :  { %2006 = vmatpush3.bf16.msra.mxu0 %v2005_v8 }
 0x5d2   :  { %2007 = vmatprep.subr.bf16.mxu0 %v2164_v20 }
 0x5d5   :  { %2009 = vmatpush3.bf16.msra.mxu0 %v2008_v17 }
 0x68b   :  { %v1314_v9 = vpop.f32.mrb[10].mxu0  ;;  %v1385_v12 = vpop.f32.mrb[22].mxu1 }
 0x68c   :  { %v1390_v18 = vadd.f32 %v1314_v9, %v2456_v53  ;;  %v1316_v19 = vpop.f32.mrb[11].mxu0  ;;  %v1387_v24 = vpop.f32.mrb[23].mxu1  ;;  %v1396_v1 = vmul.f32 0.5, %v1385_v12 }
 0x68d   :  { %v1391_v45 = vadd.f32 %v1316_v19, %v2458_v54 }
 0x68e   :  { %v1394_v27 = vmul.f32 0.5, %v1390_v18 }
 0x68f   :  { %v1395_v46 = vmul.f32 0.5, %v1391_v45 }
 0x690   :  { %2097 = vtanh.f32 %v1394_v27 }
 0x691   :  { %2099 = vtanh.f32 %v1395_v46 }
 0x692   :  { %2101 = vtanh.f32 %v1387_v24 }
 0x693   :  { %2103 = vtanh.f32 %v1396_v1 }
 0x69a   :  { %v2098_v29 = vpop.eup %2097 }
 0x69b   :  { %v2100_v37 = vpop.eup %2099  ;;  %v1402_v39 = vmul.f32 0.5, %v2098_v29 }
 0x69c   :  { %v1403_v43 = vmul.f32 0.5, %v2100_v37  ;;  %v2102_v14 = vpop.eup %2101 }
 0x69d   :  { %v1406_v13 = vadd.f32 0.5, %v1402_v39  ;;  %v2104_v54 = vpop.eup %2103 }
 0x69e   :  { %v1407_v21 = vadd.f32 0.5, %v1403_v43  ;;  %v1404_v32 = vmul.f32 0.5, %v2104_v54 }
 0x69f   :  { %v1411_v22 = vmul.f32 %v2102_v14, %v1406_v13 }
 0x6a0   :  { %v1410_v53 = vmul.f32 %v1407_v21, %v2614_v41  ;;  %v1408_v42 = vadd.f32 0.5, %v1404_v32 }
 0x6a2   :  { %v1412_v28 = vadd.f32 %v1411_v22, %v1410_v53 }
 0x6a4   :  { %2105 = vtanh.f32 %v1412_v28 }
 0x6ae   :  { %v2106_v44 = vpop.eup %2105 }
 0x6af   :  { %v1414_v49 = vmul.f32 %v2106_v44, %v1408_v42 }
 0x6b1   :  { %1588 = vmatmul.mubr.f32.vlgmr.msra.gmra.mrb[12].mxu0 %v1414_v49 }
 0x784   :  { %v1504_v55 = vpop.f32.mrb[12].mxu0 }
 0x785   :  { %v1505_v56 = vadd.f32 %v1537_v50, %v1504_v55  ;;  %v1589_v61 = vpop.f32.mrb[13].mxu0 }
 0x787   :  { %1508 = vst [vmem:[%s2632_s5] sm:$0xff] %v1505_v56 }
 0x788   :  { %1513 = vsyncpa [#allocation3], 1 }
 0x789   :  { %1514 = vsyncpa [#allocation5], 1 }

</bundles_post_ra>
